<compile_context>
chip_gen: v7x
topology: tpu7x:2x2x1
jax: 0.10.0
libtpu: 0.0.40
codegen_flags: <defaults>
</compile_context>

<pallas_src>
import functools

import jax
import jax.numpy as jnp
from jax.experimental import pallas as pl
from jax.experimental.pallas import tpu as pltpu

LANE = 128
TB_CAP = 512        # max batch-tile rows per grid step
CHAIN_ROWS = 128    # target rows per independent sub-chain inside the body


def round_up(n, m):
    return ((n + m - 1) // m) * m


def cdiv(a, b):
    return -(-a // b)


# --------------------------------------------------------------------------
# Kernel
# --------------------------------------------------------------------------
def vae_forward_kernel(x_ref, eps_ref,
                       w1_ref, b1_ref, w2_ref, b2_ref,
                       wh_ref, bh_ref,
                       w3_ref, b3_ref, w3b_ref, b3b_ref,
                       w4_ref, b4_ref,
                       xobs_ref, latent_ref, *, n_chunks):
    bf16 = jnp.bfloat16
    pz = eps_ref.shape[-1]                 # padded z width (multiple of 128)
    rows_per = x_ref.shape[0] // n_chunks  # multiple of 8 by construction

    def linear(a, w_ref, b_ref):
        # bf16 MXU operands, f32 accumulation; everything downstream is f32.
        return jnp.dot(a.astype(bf16), w_ref[...],
                       preferred_element_type=jnp.float32) + b_ref[...]

    # n_chunks independent layer chains (static unroll). No data dependence
    # between chains -> the LLO scheduler interleaves MXU / VPU / EUP work
    # across them, filling the bubbles of a single serial 6-matmul chain.
    for c in range(n_chunks):
        rows = slice(c * rows_per, (c + 1) * rows_per)  # static, sublane-aligned

        # ---- encode ----
        h1 = jnp.maximum(linear(x_ref[rows, :], w1_ref, b1_ref), 0.0)
        h2 = jnp.maximum(linear(h1, w2_ref, b2_ref), 0.0)

        # fused mu/logvar head: one (rows, 2*P_Z) matmul, split w/ static slices
        head = linear(h2, wh_ref, bh_ref)
        mu = head[:, :pz]
        logvar = head[:, pz:]

        # ---- reparameterize (test_mode=False): z = mu + eps*exp(0.5*logvar) ----
        std = jnp.exp(0.5 * logvar)
        z = mu + eps_ref[rows, :] * std

        # ---- decode ----
        h3 = jnp.maximum(linear(z, w3_ref, b3_ref), 0.0)
        h3b = jnp.maximum(linear(h3, w3b_ref, b3b_ref), 0.0)
        h4 = linear(h3b, w4_ref, b4_ref)   # mnist=False -> no sigmoid

        xobs_ref[rows, :] = h4
        # lane-aligned 128-wide stores into the single latent slab
        latent_ref[rows, 0 * pz:1 * pz] = mu
        latent_ref[rows, 1 * pz:2 * pz] = logvar
        latent_ref[rows, 2 * pz:3 * pz] = z


# --------------------------------------------------------------------------
# Tiling: avoid double rounding; guarantee >=2 grid steps for v7x megacore.
# --------------------------------------------------------------------------
def _choose_tiling(B):
    """Returns (TB, B_pad, grid_steps, n_chunks)."""
    if B <= 8:
        return 8, 8, 1, 1
    # >= 2 steps so both v7x TensorCores get work; tiles capped at TB_CAP rows.
    steps = max(2, cdiv(B, TB_CAP))
    # pad per-tile rows only to a multiple of 16 (even split into 8-row-aligned
    # sub-chains) -> total dead rows <= 16*steps, not up to a whole tile.
    tb = round_up(cdiv(B, steps), 16)
    n_chunks = 4 if (tb >= 4 * CHAIN_ROWS and tb % 32 == 0) else 2
    return tb, steps * tb, steps, n_chunks


# --------------------------------------------------------------------------
# Wrapper
# --------------------------------------------------------------------------
@jax.jit
def vae_forward(x, m, eps, kparams):
    """Mirrors VAE.forward(x, m, test_mode=False, L=1). `m` is unused (as in torch)."""
    del m
    B, num_in = x.shape
    z_dim = eps.shape[1]
    P_IN, P_H = kparams["w1"].shape
    P_Z = kparams["w3"].shape[0]

    TB, B_pad, steps, n_chunks = _choose_tiling(B)
    grid = (steps,)

    # TODO(synk): at toy sizes these wrapper-side pads/casts are separate XLA
    # HBM passes that dominate the ~us kernel; fold them into the data
    # producer when deploying.
    x_pad = jnp.pad(x.astype(jnp.bfloat16),
                    ((0, B_pad - B), (0, P_IN - num_in)))
    eps_pad = jnp.pad(eps.astype(jnp.float32),
                      ((0, B_pad - B), (0, P_Z - z_dim)))

    def batch_spec(cols):
        return pl.BlockSpec((TB, cols), lambda i: (i, 0))

    def resident_spec(arr):
        # full array, constant block index -> stays in VMEM across grid steps
        return pl.BlockSpec(arr.shape, lambda i: (0, 0))

    weight_order = ("w1", "b1", "w2", "b2", "w_head", "b_head",
                    "w3", "b3", "w3b", "b3b", "w4", "b4")
    weight_ins = tuple(kparams[k] for k in weight_order)

    in_specs = [batch_spec(P_IN), batch_spec(P_Z)] + \
               [resident_spec(w) for w in weight_ins]
    out_specs = (batch_spec(P_IN), batch_spec(3 * P_Z))
    out_shape = (
        jax.ShapeDtypeStruct((B_pad, P_IN), jnp.float32),
        jax.ShapeDtypeStruct((B_pad, 3 * P_Z), jnp.float32),
    )

    # advisory cost estimate for XLA's scheduler
    flops = 2 * B_pad * (P_IN * P_H + P_H * P_H + P_H * 2 * P_Z
                         + P_Z * P_H + P_H * P_H + P_H * P_IN)
    transcendentals = B_pad * P_Z
    bytes_accessed = int(
        sum(v.size * v.dtype.itemsize for v in weight_ins)
        + x_pad.size * x_pad.dtype.itemsize
        + eps_pad.size * eps_pad.dtype.itemsize
        + B_pad * P_IN * 4 + B_pad * 3 * P_Z * 4)

    kernel = functools.partial(vae_forward_kernel, n_chunks=n_chunks)

    xobs_pad, latent = pl.pallas_call(
        kernel,
        out_shape=out_shape,
        grid_spec=pltpu.PrefetchScalarGridSpec(
            num_scalar_prefetch=0,
            grid=grid,
            in_specs=in_specs,
            out_specs=out_specs,
        ),
        compiler_params=pltpu.CompilerParams(
            dimension_semantics=("parallel",),      # shard batch over v7x's 2 TCs
            # actual per-step use is ~3 MiB even at TB=512 (double-buffered
            # tiles + ~0.3 MiB bf16 weights); stay well under v7x's 64 MiB.
            vmem_limit_bytes=48 * 1024 * 1024,
        ),
        cost_estimate=pl.CostEstimate(
            flops=flops,
            transcendentals=transcendentals,
            bytes_accessed=bytes_accessed),
    )(x_pad, eps_pad, *weight_ins)

    # slice padded outputs back to logical shapes (keeps padded-lane leakage out)
    xobs = xobs_pad[:B, :num_in]
    mu = latent[:B, 0 * P_Z:0 * P_Z + z_dim]
    logvar = latent[:B, 1 * P_Z:1 * P_Z + z_dim]
    z = latent[:B, 2 * P_Z:2 * P_Z + z_dim]

    recon = {"xobs": xobs, "xmis": None, "M_sim_miss": None}
    variational_params = {
        "z_mu": mu,
        "z_logvar": logvar,
        "z_mu_prior": jnp.zeros_like(mu),
        "z_logvar_prior": jnp.zeros_like(logvar),
        "qy": None,
        "xmis": None,
        "xmis_mu": None,
        "xmis_logvar": None,
        "xmis_mu_prior": None,
        "xmis_logvar_prior": None,
    }
    latent_samples = {"z": z}
    return recon, variational_params, latent_samples


# --------------------------------------------------------------------------
# Params (PyTorch-style init) + padding for the kernel
# --------------------------------------------------------------------------
def init_linear(key, fan_in, fan_out):
    """PyTorch nn.Linear default init: U(-1/sqrt(fan_in), 1/sqrt(fan_in))."""
    kw, kb = jax.random.split(key)
    bound = 1.0 / jnp.sqrt(fan_in)
    # weight stored as (in, out) = transpose of torch's (out, in)
    w = jax.random.uniform(kw, (fan_in, fan_out), jnp.float32, -bound, bound)
    b = jax.random.uniform(kb, (1, fan_out), jnp.float32, -bound, bound)
    return w, b


def make_params(key, num_in, h_dim, z_dim):
    keys = jax.random.split(key, 7)
    p = {}
    p["w1"], p["b1"] = init_linear(keys[0], num_in, h_dim)
    p["w2"], p["b2"] = init_linear(keys[1], h_dim, h_dim)
    p["w21"], p["b21"] = init_linear(keys[2], h_dim, z_dim)
    p["w22"], p["b22"] = init_linear(keys[3], h_dim, z_dim)
    p["w3"], p["b3"] = init_linear(keys[4], z_dim, h_dim)
    p["w3b"], p["b3b"] = init_linear(keys[5], h_dim, h_dim)
    p["w4"], p["b4"] = init_linear(keys[6], h_dim, num_in)
    return p


def _pad_to(a, shape):
    return jnp.pad(a, [(0, s - d) for d, s in zip(a.shape, shape)])


def pad_params_for_kernel(p, num_in, h_dim, z_dim):
    """Zero-pad to 128-lane tiles, fuse mu/logvar head, weights -> bf16."""
    P_IN = round_up(num_in, LANE)
    P_H = round_up(h_dim, LANE)
    P_Z = round_up(z_dim, LANE)
    bf16, f32 = jnp.bfloat16, jnp.float32

    kp = {}
    kp["w1"] = _pad_to(p["w1"], (P_IN, P_H)).astype(bf16)
    kp["b1"] = _pad_to(p["b1"], (1, P_H)).astype(f32)
    kp["w2"] = _pad_to(p["w2"], (P_H, P_H)).astype(bf16)
    kp["b2"] = _pad_to(p["b2"], (1, P_H)).astype(f32)

    w_head = jnp.zeros((P_H, 2 * P_Z), f32)
    w_head = w_head.at[:h_dim, :z_dim].set(p["w21"])
    w_head = w_head.at[:h_dim, P_Z:P_Z + z_dim].set(p["w22"])
    kp["w_head"] = w_head.astype(bf16)
    b_head = jnp.zeros((1, 2 * P_Z), f32)
    b_head = b_head.at[:, :z_dim].set(p["b21"])
    b_head = b_head.at[:, P_Z:P_Z + z_dim].set(p["b22"])
    kp["b_head"] = b_head

    kp["w3"] = _pad_to(p["w3"], (P_Z, P_H)).astype(bf16)
    kp["b3"] = _pad_to(p["b3"], (1, P_H)).astype(f32)
    kp["w3b"] = _pad_to(p["w3b"], (P_H, P_H)).astype(bf16)
    kp["b3b"] = _pad_to(p["b3b"], (1, P_H)).astype(f32)
    kp["w4"] = _pad_to(p["w4"], (P_H, P_IN)).astype(bf16)
    kp["b4"] = _pad_to(p["b4"], (1, P_IN)).astype(f32)
    return kp


# --------------------------------------------------------------------------
# Plain-JAX reference (mirrors the kernel's bf16-operand / f32-accum matmuls)
# --------------------------------------------------------------------------
def reference_forward(x, eps, p):
    bf16 = jnp.bfloat16
    lin = lambda a, w, b: jnp.dot(a.astype(bf16), w.astype(bf16),
                                  preferred_element_type=jnp.float32) + b
    relu = lambda v: jnp.maximum(v, 0.0)
    h1 = relu(lin(x, p["w1"], p["b1"]))
    h2 = relu(lin(h1, p["w2"], p["b2"]))
    mu = lin(h2, p["w21"], p["b21"])
    logvar = lin(h2, p["w22"], p["b22"])
    z = mu + eps * jnp.exp(0.5 * logvar)
    h3 = relu(lin(z, p["w3"], p["b3"]))
    h3b = relu(lin(h3, p["w3b"], p["b3b"]))
    h4 = lin(h3b, p["w4"], p["b4"])
    return h4, mu, logvar, z


def _check(recon, variational_params, latent_samples, x, eps, raw_params):
    ref_xobs, ref_mu, ref_logvar, ref_z = reference_forward(x, eps, raw_params)
    atol = rtol = 2e-2
    assert jnp.allclose(recon["xobs"], ref_xobs, atol=atol, rtol=rtol)
    assert jnp.allclose(variational_params["z_mu"], ref_mu, atol=atol, rtol=rtol)
    assert jnp.allclose(variational_params["z_logvar"], ref_logvar, atol=atol, rtol=rtol)
    assert jnp.allclose(latent_samples["z"], ref_z, atol=atol, rtol=rtol)


if __name__ == "__main__":
    num_in, h_dim, z_dim = 32, 32, 16

    key = jax.random.PRNGKey(0)
    k_params, k_x, k_eps, k_m, k_x2, k_eps2 = jax.random.split(key, 6)

    raw_params = make_params(k_params, num_in, h_dim, z_dim)
    kernel_params = pad_params_for_kernel(raw_params, num_in, h_dim, z_dim)

    # --- small batch (single grid step, single chain) ---
    B = 8
    x = jax.random.normal(k_x, (B, num_in), jnp.float32)
    m = (jax.random.uniform(k_m, (B, num_in)) > 0.5).astype(jnp.float32)  # mask (unused)
    # TODO(synk): torch.randn_like(std) has no in-kernel equivalent; eps is
    # drawn outside the kernel for determinism and consumed inside it.
    eps = jax.random.normal(k_eps, (B, z_dim), jnp.float32)

    recon, vparams, lat = vae_forward(x, m, eps, kernel_params)
    jax.block_until_ready(recon["xobs"])
    _check(recon, vparams, lat, x, eps, raw_params)

    # --- ragged batch (exercises the 2-step grid + 2-sub-chain body + padding) ---
    B2 = 40
    x2 = jax.random.normal(k_x2, (B2, num_in), jnp.float32)
    m2 = jnp.ones((B2, num_in), jnp.float32)
    eps2 = jax.random.normal(k_eps2, (B2, z_dim), jnp.float32)

    recon2, vparams2, lat2 = vae_forward(x2, m2, eps2, kernel_params)
    jax.block_until_ready(recon2["xobs"])
    _check(recon2, vparams2, lat2, x2, eps2, raw_params)

    print("KERNEL_OK")
</pallas_src>

<mosaic_0001>
module attributes {stable_mosaic.version = 11 : i64} {
  func.func @vae_forward_kernel(%arg0: i32, %arg1: memref<8x128xbf16, #tpu.memory_space<vmem>>, %arg2: memref<8x128xf32, #tpu.memory_space<vmem>>, %arg3: memref<128x128xbf16, #tpu.memory_space<vmem>>, %arg4: memref<1x128xf32, #tpu.memory_space<vmem>>, %arg5: memref<128x128xbf16, #tpu.memory_space<vmem>>, %arg6: memref<1x128xf32, #tpu.memory_space<vmem>>, %arg7: memref<128x256xbf16, #tpu.memory_space<vmem>>, %arg8: memref<1x256xf32, #tpu.memory_space<vmem>>, %arg9: memref<128x128xbf16, #tpu.memory_space<vmem>>, %arg10: memref<1x128xf32, #tpu.memory_space<vmem>>, %arg11: memref<128x128xbf16, #tpu.memory_space<vmem>>, %arg12: memref<1x128xf32, #tpu.memory_space<vmem>>, %arg13: memref<128x128xbf16, #tpu.memory_space<vmem>>, %arg14: memref<1x128xf32, #tpu.memory_space<vmem>>, %arg15: memref<8x128xf32, #tpu.memory_space<vmem>>, %arg16: memref<8x384xf32, #tpu.memory_space<vmem>>) attributes {dimension_semantics = [#tpu.dimension_semantics<parallel>], iteration_bounds = array<i64: 1>, scalar_prefetch = 0 : i64, scratch_operands = 0 : i64, tpu.core_type = #tpu.core_type<tc>, window_params = [{transform_indices = @transform_0, window_bounds = array<i64: 8, 128>}, {transform_indices = @transform_1, window_bounds = array<i64: 8, 128>}, {pipeline_mode = #tpu.pipeline_mode<synchronous>, transform_indices = @transform_2, window_bounds = array<i64: 128, 128>}, {pipeline_mode = #tpu.pipeline_mode<synchronous>, transform_indices = @transform_3, window_bounds = array<i64: 1, 128>}, {pipeline_mode = #tpu.pipeline_mode<synchronous>, transform_indices = @transform_4, window_bounds = array<i64: 128, 128>}, {pipeline_mode = #tpu.pipeline_mode<synchronous>, transform_indices = @transform_5, window_bounds = array<i64: 1, 128>}, {pipeline_mode = #tpu.pipeline_mode<synchronous>, transform_indices = @transform_6, window_bounds = array<i64: 128, 256>}, {pipeline_mode = #tpu.pipeline_mode<synchronous>, transform_indices = @transform_7, window_bounds = array<i64: 1, 256>}, {pipeline_mode = #tpu.pipeline_mode<synchronous>, transform_indices = @transform_8, window_bounds = array<i64: 128, 128>}, {pipeline_mode = #tpu.pipeline_mode<synchronous>, transform_indices = @transform_9, window_bounds = array<i64: 1, 128>}, {pipeline_mode = #tpu.pipeline_mode<synchronous>, transform_indices = @transform_10, window_bounds = array<i64: 128, 128>}, {pipeline_mode = #tpu.pipeline_mode<synchronous>, transform_indices = @transform_11, window_bounds = array<i64: 1, 128>}, {pipeline_mode = #tpu.pipeline_mode<synchronous>, transform_indices = @transform_12, window_bounds = array<i64: 128, 128>}, {pipeline_mode = #tpu.pipeline_mode<synchronous>, transform_indices = @transform_13, window_bounds = array<i64: 1, 128>}, {transform_indices = @transform_14, window_bounds = array<i64: 8, 128>}, {transform_indices = @transform_15, window_bounds = array<i64: 8, 384>}]} {
    %c0 = arith.constant 0 : index
    %c0_0 = arith.constant 0 : index
    %0 = vector.load %arg1[%c0, %c0_0] : memref<8x128xbf16, #tpu.memory_space<vmem>>, vector<8x128xbf16>
    %c0_1 = arith.constant 0 : index
    %c0_2 = arith.constant 0 : index
    %1 = vector.load %arg3[%c0_1, %c0_2] : memref<128x128xbf16, #tpu.memory_space<vmem>>, vector<128x128xbf16>
    %cst = arith.constant dense<0.000000e+00> : vector<8x128xf32>
    %2 = tpu.matmul %0, %1, %cst {dimension_numbers = #tpu.dot_dimension_numbers<[1], [0], [0], [1], [0, 0, 1, 1], [], []>} : vector<8x128xbf16>, vector<128x128xbf16>, vector<8x128xf32> -> vector<8x128xf32>
    %c0_3 = arith.constant 0 : index
    %c0_4 = arith.constant 0 : index
    %3 = vector.load %arg4[%c0_3, %c0_4] : memref<1x128xf32, #tpu.memory_space<vmem>>, vector<1x128xf32>
    %4 = vector.broadcast %3 : vector<1x128xf32> to vector<8x128xf32>
    %5 = arith.addf %2, %4 : vector<8x128xf32>
    %cst_5 = arith.constant 0.000000e+00 : f32
    %6 = vector.broadcast %cst_5 : f32 to vector<8x128xf32>
    %7 = arith.maximumf %5, %6 : vector<8x128xf32>
    %8 = arith.truncf %7 : vector<8x128xf32> to vector<8x128xbf16>
    %c0_6 = arith.constant 0 : index
    %c0_7 = arith.constant 0 : index
    %9 = vector.load %arg5[%c0_6, %c0_7] : memref<128x128xbf16, #tpu.memory_space<vmem>>, vector<128x128xbf16>
    %cst_8 = arith.constant dense<0.000000e+00> : vector<8x128xf32>
    %10 = tpu.matmul %8, %9, %cst_8 {dimension_numbers = #tpu.dot_dimension_numbers<[1], [0], [0], [1], [0, 0, 1, 1], [], []>} : vector<8x128xbf16>, vector<128x128xbf16>, vector<8x128xf32> -> vector<8x128xf32>
    %c0_9 = arith.constant 0 : index
    %c0_10 = arith.constant 0 : index
    %11 = vector.load %arg6[%c0_9, %c0_10] : memref<1x128xf32, #tpu.memory_space<vmem>>, vector<1x128xf32>
    %12 = vector.broadcast %11 : vector<1x128xf32> to vector<8x128xf32>
    %13 = arith.addf %10, %12 : vector<8x128xf32>
    %cst_11 = arith.constant 0.000000e+00 : f32
    %14 = vector.broadcast %cst_11 : f32 to vector<8x128xf32>
    %15 = arith.maximumf %13, %14 : vector<8x128xf32>
    %16 = arith.truncf %15 : vector<8x128xf32> to vector<8x128xbf16>
    %c0_12 = arith.constant 0 : index
    %c0_13 = arith.constant 0 : index
    %17 = vector.load %arg7[%c0_12, %c0_13] : memref<128x256xbf16, #tpu.memory_space<vmem>>, vector<128x256xbf16>
    %cst_14 = arith.constant dense<0.000000e+00> : vector<8x256xf32>
    %18 = tpu.matmul %16, %17, %cst_14 {dimension_numbers = #tpu.dot_dimension_numbers<[1], [0], [0], [1], [0, 0, 1, 1], [], []>} : vector<8x128xbf16>, vector<128x256xbf16>, vector<8x256xf32> -> vector<8x256xf32>
    %c0_15 = arith.constant 0 : index
    %c0_16 = arith.constant 0 : index
    %19 = vector.load %arg8[%c0_15, %c0_16] : memref<1x256xf32, #tpu.memory_space<vmem>>, vector<1x256xf32>
    %20 = vector.broadcast %19 : vector<1x256xf32> to vector<8x256xf32>
    %21 = arith.addf %18, %20 : vector<8x256xf32>
    %22 = vector.extract_strided_slice %21 {offsets = [0, 0], sizes = [8, 128], strides = [1, 1]} : vector<8x256xf32> to vector<8x128xf32>
    %23 = vector.extract_strided_slice %21 {offsets = [0, 128], sizes = [8, 128], strides = [1, 1]} : vector<8x256xf32> to vector<8x128xf32>
    %cst_17 = arith.constant 5.000000e-01 : f32
    %24 = vector.broadcast %cst_17 : f32 to vector<8x128xf32>
    %25 = arith.mulf %24, %23 : vector<8x128xf32>
    %26 = math.exp %25 : vector<8x128xf32>
    %c0_18 = arith.constant 0 : index
    %c0_19 = arith.constant 0 : index
    %27 = vector.load %arg2[%c0_18, %c0_19] : memref<8x128xf32, #tpu.memory_space<vmem>>, vector<8x128xf32>
    %28 = arith.mulf %27, %26 : vector<8x128xf32>
    %29 = arith.addf %22, %28 : vector<8x128xf32>
    %30 = arith.truncf %29 : vector<8x128xf32> to vector<8x128xbf16>
    %c0_20 = arith.constant 0 : index
    %c0_21 = arith.constant 0 : index
    %31 = vector.load %arg9[%c0_20, %c0_21] : memref<128x128xbf16, #tpu.memory_space<vmem>>, vector<128x128xbf16>
    %cst_22 = arith.constant dense<0.000000e+00> : vector<8x128xf32>
    %32 = tpu.matmul %30, %31, %cst_22 {dimension_numbers = #tpu.dot_dimension_numbers<[1], [0], [0], [1], [0, 0, 1, 1], [], []>} : vector<8x128xbf16>, vector<128x128xbf16>, vector<8x128xf32> -> vector<8x128xf32>
    %c0_23 = arith.constant 0 : index
    %c0_24 = arith.constant 0 : index
    %33 = vector.load %arg10[%c0_23, %c0_24] : memref<1x128xf32, #tpu.memory_space<vmem>>, vector<1x128xf32>
    %34 = vector.broadcast %33 : vector<1x128xf32> to vector<8x128xf32>
    %35 = arith.addf %32, %34 : vector<8x128xf32>
    %cst_25 = arith.constant 0.000000e+00 : f32
    %36 = vector.broadcast %cst_25 : f32 to vector<8x128xf32>
    %37 = arith.maximumf %35, %36 : vector<8x128xf32>
    %38 = arith.truncf %37 : vector<8x128xf32> to vector<8x128xbf16>
    %c0_26 = arith.constant 0 : index
    %c0_27 = arith.constant 0 : index
    %39 = vector.load %arg11[%c0_26, %c0_27] : memref<128x128xbf16, #tpu.memory_space<vmem>>, vector<128x128xbf16>
    %cst_28 = arith.constant dense<0.000000e+00> : vector<8x128xf32>
    %40 = tpu.matmul %38, %39, %cst_28 {dimension_numbers = #tpu.dot_dimension_numbers<[1], [0], [0], [1], [0, 0, 1, 1], [], []>} : vector<8x128xbf16>, vector<128x128xbf16>, vector<8x128xf32> -> vector<8x128xf32>
    %c0_29 = arith.constant 0 : index
    %c0_30 = arith.constant 0 : index
    %41 = vector.load %arg12[%c0_29, %c0_30] : memref<1x128xf32, #tpu.memory_space<vmem>>, vector<1x128xf32>
    %42 = vector.broadcast %41 : vector<1x128xf32> to vector<8x128xf32>
    %43 = arith.addf %40, %42 : vector<8x128xf32>
    %cst_31 = arith.constant 0.000000e+00 : f32
    %44 = vector.broadcast %cst_31 : f32 to vector<8x128xf32>
    %45 = arith.maximumf %43, %44 : vector<8x128xf32>
    %46 = arith.truncf %45 : vector<8x128xf32> to vector<8x128xbf16>
    %c0_32 = arith.constant 0 : index
    %c0_33 = arith.constant 0 : index
    %47 = vector.load %arg13[%c0_32, %c0_33] : memref<128x128xbf16, #tpu.memory_space<vmem>>, vector<128x128xbf16>
    %cst_34 = arith.constant dense<0.000000e+00> : vector<8x128xf32>
    %48 = tpu.matmul %46, %47, %cst_34 {dimension_numbers = #tpu.dot_dimension_numbers<[1], [0], [0], [1], [0, 0, 1, 1], [], []>} : vector<8x128xbf16>, vector<128x128xbf16>, vector<8x128xf32> -> vector<8x128xf32>
    %c0_35 = arith.constant 0 : index
    %c0_36 = arith.constant 0 : index
    %49 = vector.load %arg14[%c0_35, %c0_36] : memref<1x128xf32, #tpu.memory_space<vmem>>, vector<1x128xf32>
    %50 = vector.broadcast %49 : vector<1x128xf32> to vector<8x128xf32>
    %51 = arith.addf %48, %50 : vector<8x128xf32>
    %c0_37 = arith.constant 0 : index
    %c0_38 = arith.constant 0 : index
    %52 = vector.load %arg15[%c0_37, %c0_38] : memref<8x128xf32, #tpu.memory_space<vmem>>, vector<8x128xf32>
    tpu.vector_store %arg15[%c0_37, %c0_38], %51 {strides = array<i32>} : memref<8x128xf32, #tpu.memory_space<vmem>>, vector<8x128xf32>,
    %c0_39 = arith.constant 0 : index
    %c0_40 = arith.constant 0 : index
    %53 = vector.load %arg16[%c0_39, %c0_40] : memref<8x384xf32, #tpu.memory_space<vmem>>, vector<8x128xf32>
    tpu.vector_store %arg16[%c0_39, %c0_40], %22 {strides = array<i32>} : memref<8x384xf32, #tpu.memory_space<vmem>>, vector<8x128xf32>,
    %c0_41 = arith.constant 0 : index
    %c128 = arith.constant 128 : index
    %54 = vector.load %arg16[%c0_41, %c128] : memref<8x384xf32, #tpu.memory_space<vmem>>, vector<8x128xf32>
    tpu.vector_store %arg16[%c0_41, %c128], %23 {strides = array<i32>} : memref<8x384xf32, #tpu.memory_space<vmem>>, vector<8x128xf32>,
    %c0_42 = arith.constant 0 : index
    %c256 = arith.constant 256 : index
    %55 = vector.load %arg16[%c0_42, %c256] : memref<8x384xf32, #tpu.memory_space<vmem>>, vector<8x128xf32>
    tpu.vector_store %arg16[%c0_42, %c256], %29 {strides = array<i32>} : memref<8x384xf32, #tpu.memory_space<vmem>>, vector<8x128xf32>,
    return
  }
  func.func @transform_0(%arg0: i32) -> (i32, i32) {
    %c0_i32 = arith.constant 0 : i32
    %c0_i32_0 = arith.constant 0 : i32
    return %arg0, %c0_i32 : i32, i32
  }
  func.func @transform_1(%arg0: i32) -> (i32, i32) {
    %c0_i32 = arith.constant 0 : i32
    %c0_i32_0 = arith.constant 0 : i32
    return %arg0, %c0_i32 : i32, i32
  }
  func.func @transform_2(%arg0: i32) -> (i32, i32) {
    %c0_i32 = arith.constant 0 : i32
    %c0_i32_0 = arith.constant 0 : i32
    %c0_i32_1 = arith.constant 0 : i32
    return %c0_i32, %c0_i32_0 : i32, i32
  }
  func.func @transform_3(%arg0: i32) -> (i32, i32) {
    %c0_i32 = arith.constant 0 : i32
    %c0_i32_0 = arith.constant 0 : i32
    %c0_i32_1 = arith.constant 0 : i32
    return %c0_i32, %c0_i32_0 : i32, i32
  }
  func.func @transform_4(%arg0: i32) -> (i32, i32) {
    %c0_i32 = arith.constant 0 : i32
    %c0_i32_0 = arith.constant 0 : i32
    %c0_i32_1 = arith.constant 0 : i32
    return %c0_i32, %c0_i32_0 : i32, i32
  }
  func.func @transform_5(%arg0: i32) -> (i32, i32) {
    %c0_i32 = arith.constant 0 : i32
    %c0_i32_0 = arith.constant 0 : i32
    %c0_i32_1 = arith.constant 0 : i32
    return %c0_i32, %c0_i32_0 : i32, i32
  }
  func.func @transform_6(%arg0: i32) -> (i32, i32) {
    %c0_i32 = arith.constant 0 : i32
    %c0_i32_0 = arith.constant 0 : i32
    %c0_i32_1 = arith.constant 0 : i32
    return %c0_i32, %c0_i32_0 : i32, i32
  }
  func.func @transform_7(%arg0: i32) -> (i32, i32) {
    %c0_i32 = arith.constant 0 : i32
    %c0_i32_0 = arith.constant 0 : i32
    %c0_i32_1 = arith.constant 0 : i32
    return %c0_i32, %c0_i32_0 : i32, i32
  }
  func.func @transform_8(%arg0: i32) -> (i32, i32) {
    %c0_i32 = arith.constant 0 : i32
    %c0_i32_0 = arith.constant 0 : i32
    %c0_i32_1 = arith.constant 0 : i32
    return %c0_i32, %c0_i32_0 : i32, i32
  }
  func.func @transform_9(%arg0: i32) -> (i32, i32) {
    %c0_i32 = arith.constant 0 : i32
    %c0_i32_0 = arith.constant 0 : i32
    %c0_i32_1 = arith.constant 0 : i32
    return %c0_i32, %c0_i32_0 : i32, i32
  }
  func.func @transform_10(%arg0: i32) -> (i32, i32) {
    %c0_i32 = arith.constant 0 : i32
    %c0_i32_0 = arith.constant 0 : i32
    %c0_i32_1 = arith.constant 0 : i32
    return %c0_i32, %c0_i32_0 : i32, i32
  }
  func.func @transform_11(%arg0: i32) -> (i32, i32) {
    %c0_i32 = arith.constant 0 : i32
    %c0_i32_0 = arith.constant 0 : i32
    %c0_i32_1 = arith.constant 0 : i32
    return %c0_i32, %c0_i32_0 : i32, i32
  }
  func.func @transform_12(%arg0: i32) -> (i32, i32) {
    %c0_i32 = arith.constant 0 : i32
    %c0_i32_0 = arith.constant 0 : i32
    %c0_i32_1 = arith.constant 0 : i32
    return %c0_i32, %c0_i32_0 : i32, i32
  }
  func.func @transform_13(%arg0: i32) -> (i32, i32) {
    %c0_i32 = arith.constant 0 : i32
    %c0_i32_0 = arith.constant 0 : i32
    %c0_i32_1 = arith.constant 0 : i32
    return %c0_i32, %c0_i32_0 : i32, i32
  }
  func.func @transform_14(%arg0: i32) -> (i32, i32) {
    %c0_i32 = arith.constant 0 : i32
    %c0_i32_0 = arith.constant 0 : i32
    return %arg0, %c0_i32 : i32, i32
  }
  func.func @transform_15(%arg0: i32) -> (i32, i32) {
    %c0_i32 = arith.constant 0 : i32
    %c0_i32_0 = arith.constant 0 : i32
    return %arg0, %c0_i32 : i32, i32
  }
}

</mosaic_0001>

<bundles_post_ra>
// kernel: vae_forward.1
= control target key start
LH: loop header
LB: loop body
LE: loop exit
PB: predicated region body
PF: predicated region fallthrough
CT: control target
= control target key end

     0   :  { %21 = vsyncpa [#allocation3], 0  ;;  %s1757_s0 = inlined_call_operand.vmem [shape: bf16[8,128], index: 0, kind: input, shape index: {}]   ;;  %s1758_s1 = inlined_call_operand.vmem [shape: f32[8,128], index: 1, kind: input, shape index: {}]   ;;  %s1759_s2 = inlined_call_operand.vmem [shape: bf16[128,128], index: 2, kind: input, shape index: {}]   ;;  %s1760_s3 = inlined_call_operand.vmem [shape: f32[1,128], index: 3, kind: input, shape index: {}]   ;;  %s1761_s4 = inlined_call_operand.hbm [shape: bf16[128,128], index: 4, kind: input, shape index: {}]   ;;  %s1762_s5 = inlined_call_operand.hbm [shape: f32[1,128], index: 5, kind: input, shape index: {}]   ;;  %s1763_s6 = inlined_call_operand.hbm [shape: bf16[128,256], index: 6, kind: input, shape index: {}]   ;;  %s1764_s7 = inlined_call_operand.vmem [shape: f32[1,256], index: 7, kind: input, shape index: {}]   ;;  %s1765_s8 = inlined_call_operand.hbm [shape: bf16[128,128], index: 8, kind: input, shape index: {}]   ;;  %s1766_s9 = inlined_call_operand.hbm [shape: f32[1,128], index: 9, kind: input, shape index: {}]   ;;  %s1767_s10 = inlined_call_operand.hbm [shape: bf16[128,128], index: 10, kind: input, shape index: {}]   ;;  %s1768_s11 = inlined_call_operand.hbm [shape: f32[1,128], index: 11, kind: input, shape index: {}]   ;;  %s1769_s12 = inlined_call_operand.hbm [shape: bf16[128,128], index: 12, kind: input, shape index: {}]   ;;  %s1770_s13 = inlined_call_operand.hbm [shape: f32[1,128], index: 13, kind: input, shape index: {}]   ;;  %s1771_s14 = inlined_call_operand.hbm [shape: f32[8,128], index: 14, kind: output, shape index: {0}]   ;;  %s1772_s15 = inlined_call_operand.vmem [shape: f32[8,384], index: 15, kind: output, shape index: {1}]  }
   0x1   :  { %22 = vsyncpa [#allocation6], 0 }
   0x2   :  { %23 = vsyncpa [#allocation9], 0 }
   0x3   :  { %24 = vsyncpa [#allocation12], 0 }
   0x4   :  { %25 = vsyncpa [#allocation15], 0 }
   0x5   :  { %26 = vsyncpa [#allocation4], 0  ;;  %s1433_s18 = smov [#allocation5]   ;;  %s1201_s22 = scalar_lea.hbm %s1762_s5, 16 }
   0x6   :  { %s53_s19 = sshll.u32 %s1433_s18, 4  ;;  %p1202_p0 = scmp.ne.s32.totalorder %s1762_s5, %s1201_s22  ;;  %s54_s19 = int_to_ptr.vmem [resolvable:$true] %s53_s19 }
   0x7   :  { %p1205_p1 = scmp.lt.u32.totalorder %s1201_s22, %s1762_s5 }
   0x9   :  { %p1207_p2 = pnand %p1205_p1, %p1202_p0 }
   0xb   :  { %1210 = shalt.err (!%p1207_p2)
}
   0xc   :  { %s1211_s27 = scalar_lea.vmem %s54_s19, 16  ;;  %s1215_s28 = scalar_lea.vmem %s54_s19, 32 }
   0xd   :  { %p1212_p3 = scmp.ne.s32.totalorder %s54_s19, %s1211_s27  ;;  %p1216_p4 = scmp.lt.s32.totalorder %s54_s19, %s54_s19 }
   0xe   :  { %p1217_p5 = scmp.lt.s32.totalorder %s1215_s28, %s1211_s27 }
  0x10   :  { %p1218_p6 = por %p1217_p5, %p1216_p4 }
  0x12   :  { %p1219_p7 = pnand %p1218_p6, %p1212_p3 }
  0x14   :  { %1222 = shalt.err (!%p1219_p7)
}
  0x15   :  { %56 = dma.hbm_to_vmem [thread:$0]  %s1762_s5, 16, %s54_s19, [#allocation6]  }
  0x16   :  { %s1434_s16 = smov [#allocation8]   ;;  %s1435_s18 = smov [#allocation11]  }
  0x17   :  { %s76_s17 = sshll.u32 %s1434_s16, 4  ;;  %s98_s20 = sshll.u32 %s1435_s18, 4  ;;  %s77_s17 = int_to_ptr.vmem [resolvable:$true] %s76_s17  ;;  %s99_s20 = int_to_ptr.vmem [resolvable:$true] %s98_s20 }
  0x18   :  { %s1223_s23 = scalar_lea.hbm %s1765_s8, 1024 }
  0x19   :  { %p1224_p8 = scmp.ne.s32.totalorder %s1765_s8, %s1223_s23  ;;  %p1227_p9 = scmp.lt.u32.totalorder %s1223_s23, %s1765_s8 }
  0x1b   :  { %p1229_p10 = pnand %p1227_p9, %p1224_p8 }
  0x1d   :  { %1232 = shalt.err (!%p1229_p10)
}
  0x1e   :  { %s1233_s5 = scalar_lea.vmem %s77_s17, 1024  ;;  %p1238_p12 = scmp.lt.s32.totalorder %s77_s17, %s77_s17 }
  0x1f   :  { %p1234_p11 = scmp.ne.s32.totalorder %s77_s17, %s1233_s5  ;;  %p1239_p13 = scmp.lt.s32.totalorder %s1233_s5, %s1233_s5 }
  0x21   :  { %p1240_p0 = por %p1239_p13, %p1238_p12 }
  0x23   :  { %p1241_p1 = pnand %p1240_p0, %p1234_p11 }
  0x25   :  { %1244 = shalt.err (!%p1241_p1)
}
  0x26   :  { %s1436_s19 = smov 64   ;;  %s1437_s28 = smov 4  }
  0x27   :  { %82 = dma.hbm_to_vmem [thread:$0]  %s1765_s8, 1024, %s77_s17, [#allocation9], %s1436_s19, %s1436_s19, %s1437_s28  }
  0x28   :  { %s1245_s21 = scalar_lea.hbm %s1767_s10, 1024 }
  0x29   :  { %p1246_p2 = scmp.ne.s32.totalorder %s1767_s10, %s1245_s21  ;;  %p1249_p3 = scmp.lt.u32.totalorder %s1245_s21, %s1767_s10 }
  0x2b   :  { %p1251_p4 = pnand %p1249_p3, %p1246_p2 }
  0x2d   :  { %1254 = shalt.err (!%p1251_p4)
}
  0x2e   :  { %s1255_s26 = scalar_lea.vmem %s99_s20, 1024  ;;  %p1260_p6 = scmp.lt.s32.totalorder %s99_s20, %s99_s20 }
  0x2f   :  { %p1256_p5 = scmp.ne.s32.totalorder %s99_s20, %s1255_s26  ;;  %p1261_p7 = scmp.lt.s32.totalorder %s1255_s26, %s1255_s26 }
  0x31   :  { %p1262_p8 = por %p1261_p7, %p1260_p6 }
  0x33   :  { %p1263_p9 = pnand %p1262_p8, %p1256_p5 }
  0x35   :  { %1266 = shalt.err (!%p1263_p9)
}
  0x36   :  { %104 = dma.hbm_to_vmem [thread:$0]  %s1767_s10, 1024, %s99_s20, [#allocation12], %s1436_s19, %s1436_s19, %s1437_s28  }
  0x37   :  { %s1438_s27 = smov [#allocation14]   ;;  %s1439_s29 = smov [#allocation2]  }
  0x38   :  { %s120_s5 = sshll.u32 %s1438_s27, 4  ;;  %s40_s30 = sshll.u32 %s1439_s29, 4  ;;  %s121_s5 = int_to_ptr.vmem [resolvable:$true] %s120_s5  ;;  %s41_s30 = int_to_ptr.vmem [resolvable:$true] %s40_s30 }
  0x39   :  { %s1267_s21 = scalar_lea.hbm %s1769_s12, 1024 }
  0x3a   :  { %p1268_p10 = scmp.ne.s32.totalorder %s1769_s12, %s1267_s21  ;;  %p1271_p11 = scmp.lt.u32.totalorder %s1267_s21, %s1769_s12 }
  0x3c   :  { %p1273_p12 = pnand %p1271_p11, %p1268_p10 }
  0x3e   :  { %1276 = shalt.err (!%p1273_p12)
}
  0x3f   :  { %s1277_s10 = scalar_lea.vmem %s121_s5, 1024  ;;  %p1282_p0 = scmp.lt.s32.totalorder %s121_s5, %s121_s5 }
  0x40   :  { %p1278_p13 = scmp.ne.s32.totalorder %s121_s5, %s1277_s10  ;;  %p1283_p1 = scmp.lt.s32.totalorder %s1277_s10, %s1277_s10 }
  0x42   :  { %p1284_p2 = por %p1283_p1, %p1282_p0 }
  0x44   :  { %p1285_p3 = pnand %p1284_p2, %p1278_p13 }
  0x46   :  { %1288 = shalt.err (!%p1285_p3)
}
  0x47   :  { %126 = dma.hbm_to_vmem [thread:$0]  %s1769_s12, 1024, %s121_s5, [#allocation15], %s1436_s19, %s1436_s19, %s1437_s28  }
  0x48   :  { %s1289_s27 = scalar_lea.hbm %s1761_s4, 1024 }
  0x49   :  { %p1290_p4 = scmp.ne.s32.totalorder %s1761_s4, %s1289_s27  ;;  %p1293_p5 = scmp.lt.u32.totalorder %s1289_s27, %s1761_s4 }
  0x4b   :  { %p1295_p6 = pnand %p1293_p5, %p1290_p4 }
  0x4d   :  { %1298 = shalt.err (!%p1295_p6)
}
  0x4e   :  { %s1299_s22 = scalar_lea.vmem %s41_s30, 1024  ;;  %p1304_p8 = scmp.lt.s32.totalorder %s41_s30, %s41_s30 }
  0x4f   :  { %p1300_p7 = scmp.ne.s32.totalorder %s41_s30, %s1299_s22  ;;  %p1305_p9 = scmp.lt.s32.totalorder %s1299_s22, %s1299_s22 }
  0x51   :  { %p1306_p10 = por %p1305_p9, %p1304_p8 }
  0x53   :  { %p1307_p11 = pnand %p1306_p10, %p1300_p7 }
  0x55   :  { %1310 = shalt.err (!%p1307_p11)
}
  0x56   :  { %46 = dma.hbm_to_vmem [thread:$0]  %s1761_s4, 1024, %s41_s30, [#allocation3], %s1436_s19, %s1436_s19, %s1437_s28  }
  0x57   :  { %s1440_s23 = smov [#allocation7]   ;;  %s1311_s20 = scalar_lea.hbm %s1763_s6, 2048 }
  0x58   :  { %s62_s24 = sshll.u32 %s1440_s23, 4  ;;  %p1312_p12 = scmp.ne.s32.totalorder %s1763_s6, %s1311_s20  ;;  %s63_s24 = int_to_ptr.vmem [resolvable:$true] %s62_s24 }
  0x59   :  { %p1315_p13 = scmp.lt.u32.totalorder %s1311_s20, %s1763_s6 }
  0x5b   :  { %p1317_p0 = pnand %p1315_p13, %p1312_p12 }
  0x5d   :  { %1320 = shalt.err (!%p1317_p0)
}
  0x5e   :  { %s1321_s29 = scalar_lea.vmem %s63_s24, 2048  ;;  %p1326_p2 = scmp.lt.s32.totalorder %s63_s24, %s63_s24 }
  0x5f   :  { %p1322_p1 = scmp.ne.s32.totalorder %s63_s24, %s1321_s29  ;;  %p1327_p3 = scmp.lt.s32.totalorder %s1321_s29, %s1321_s29 }
  0x61   :  { %p1328_p4 = por %p1327_p3, %p1326_p2 }
  0x63   :  { %p1329_p5 = pnand %p1328_p4, %p1322_p1 }
  0x65   :  { %1332 = shalt.err (!%p1329_p5)
}
  0x66   :  { %s1441_s4 = smov 128   ;;  %s1442_s19 = smov 8  }
  0x67   :  { %68 = dma.hbm_to_vmem [thread:$0]  %s1763_s6, 2048, %s63_s24, [#allocation6], %s1441_s4, %s1441_s4, %s1442_s19  }
  0x68   :  { %s1443_s16 = smov [#allocation10]   ;;  %s1444_s21 = smov [#allocation13]  }
  0x69   :  { %s89_s18 = sshll.u32 %s1443_s16, 4  ;;  %s111_s22 = sshll.u32 %s1444_s21, 4  ;;  %s90_s18 = int_to_ptr.vmem [resolvable:$true] %s89_s18  ;;  %s112_s22 = int_to_ptr.vmem [resolvable:$true] %s111_s22 }
  0x6a   :  { %s1333_s23 = scalar_lea.hbm %s1766_s9, 16 }
  0x6b   :  { %p1334_p6 = scmp.ne.s32.totalorder %s1766_s9, %s1333_s23  ;;  %p1337_p7 = scmp.lt.u32.totalorder %s1333_s23, %s1766_s9 }
  0x6d   :  { %p1339_p8 = pnand %p1337_p7, %p1334_p6 }
  0x6f   :  { %1342 = shalt.err (!%p1339_p8)
}
  0x70   :  { %s1343_s6 = scalar_lea.vmem %s90_s18, 16  ;;  %s1347_s24 = scalar_lea.vmem %s90_s18, 32 }
  0x71   :  { %p1344_p9 = scmp.ne.s32.totalorder %s90_s18, %s1343_s6  ;;  %p1348_p10 = scmp.lt.s32.totalorder %s90_s18, %s90_s18 }
  0x72   :  { %p1349_p11 = scmp.lt.s32.totalorder %s1347_s24, %s1343_s6 }
  0x74   :  { %p1350_p12 = por %p1349_p11, %p1348_p10 }
  0x76   :  { %p1351_p13 = pnand %p1350_p12, %p1344_p9 }
  0x78   :  { %1354 = shalt.err (!%p1351_p13)
}
  0x79   :  { %92 = dma.hbm_to_vmem [thread:$0]  %s1766_s9, 16, %s90_s18, [#allocation9]  }
  0x7a   :  { %s1355_s4 = scalar_lea.hbm %s1768_s11, 16 }
  0x7b   :  { %p1356_p0 = scmp.ne.s32.totalorder %s1768_s11, %s1355_s4  ;;  %p1359_p1 = scmp.lt.u32.totalorder %s1355_s4, %s1768_s11 }
  0x7d   :  { %p1361_p2 = pnand %p1359_p1, %p1356_p0 }
  0x7f   :  { %1364 = shalt.err (!%p1361_p2)
}
  0x80   :  { %s1365_s21 = scalar_lea.vmem %s112_s22, 16  ;;  %s1369_s12 = scalar_lea.vmem %s112_s22, 32 }
  0x81   :  { %p1366_p3 = scmp.ne.s32.totalorder %s112_s22, %s1365_s21  ;;  %p1370_p4 = scmp.lt.s32.totalorder %s112_s22, %s112_s22 }
  0x82   :  { %p1371_p5 = scmp.lt.s32.totalorder %s1369_s12, %s1365_s21 }
  0x84   :  { %p1372_p6 = por %p1371_p5, %p1370_p4 }
  0x86   :  { %p1373_p7 = pnand %p1372_p6, %p1366_p3 }
  0x88   :  { %1376 = shalt.err (!%p1373_p7)
}
  0x89   :  { %114 = dma.hbm_to_vmem [thread:$0]  %s1768_s11, 16, %s112_s22, [#allocation12]  }
  0x8a   :  { %s1445_s5 = smov [#allocation16]   ;;  %s1377_s20 = scalar_lea.hbm %s1770_s13, 16 }
  0x8b   :  { %s133_s23 = sshll.u32 %s1445_s5, 4  ;;  %p1378_p8 = scmp.ne.s32.totalorder %s1770_s13, %s1377_s20  ;;  %s134_s23 = int_to_ptr.vmem [resolvable:$true] %s133_s23 }
  0x8c   :  { %p1381_p9 = scmp.lt.u32.totalorder %s1377_s20, %s1770_s13 }
  0x8e   :  { %p1383_p10 = pnand %p1381_p9, %p1378_p8 }
  0x90   :  { %1386 = shalt.err (!%p1383_p10)
}
  0x91   :  { %s1387_s17 = scalar_lea.vmem %s134_s23, 16  ;;  %s1391_s11 = scalar_lea.vmem %s134_s23, 32 }
  0x92   :  { %p1388_p11 = scmp.ne.s32.totalorder %s134_s23, %s1387_s17  ;;  %p1392_p12 = scmp.lt.s32.totalorder %s134_s23, %s134_s23 }
  0x93   :  { %p1393_p13 = scmp.lt.s32.totalorder %s1391_s11, %s1387_s17 }
  0x95   :  { %p1394_p0 = por %p1393_p13, %p1392_p12 }
  0x97   :  { %p1395_p1 = pnand %p1394_p0, %p1388_p11 }
  0x99   :  { %1398 = shalt.err (!%p1395_p1)
}
  0x9a   :  { %136 = dma.hbm_to_vmem [thread:$0]  %s1770_s13, 16, %s134_s23, [#allocation15]  }
  0x9b   :  { %1421 = dma.done.wait [#allocation3], 1024  }
  0x9c   :  { %1422 = vsyncadd [#allocation3], 4294966272 }
  0x9d   :  { %1423 = dma.done.wait [#allocation6], 2064  }
  0x9e   :  { %1424 = vsyncadd [#allocation6], 4294965232 }
  0x9f   :  { %1425 = dma.done.wait [#allocation9], 1040  }
  0xa0   :  { %1426 = vsyncadd [#allocation9], 4294966256 }
  0xa1   :  { %1427 = dma.done.wait [#allocation12], 1040  }
  0xa2   :  { %1428 = vsyncadd [#allocation12], 4294966256 }
  0xa3   :  { %1429 = dma.done.wait [#allocation15], 1040  }
  0xa4   :  { %1430 = vsyncadd [#allocation15], 4294966256  ;;  %v1446_v0 = vmov 0.0   ;;  %vm1447_vm0 = vmmov 0   ;;  %v1135_v1 = vld [vmem:[%s1759_s2] sm:$0xff]   ;;  %v1136_v2 = vld [vmem:[%s1759_s2 + $0x8] sm:$0xff]  }
  0xa5   :  { %1018 = vmatprep.subr.bf16.mxu0 %v1446_v0  ;;  %1034 = vmatprep.mubr.msk.bf16.mxu0 %vm1447_vm0, %v1446_v0  ;;  %v1137_v3 = vld [vmem:[%s1759_s2 + $0x10] sm:$0xff]   ;;  %v1143_v4 = vld [vmem:[#allocation2] sm:$0xff]   ;;  %v1138_v5 = vld [vmem:[%s1759_s2 + $0x18] sm:$0xff]   ;;  %v1448_v42 = vmov 0  }
  0xa6   :  { %1038 = vmatprep.subr.bf16.mxu1 %v1446_v0  ;;  %1054 = vmatprep.mubr.msk.bf16.mxu1 %vm1447_vm0, %v1446_v0  ;;  %v1144_v6 = vld [vmem:[#allocation2 + $0x8] sm:$0xff]   ;;  %v1139_v7 = vld [vmem:[%s1759_s2 + $0x20] sm:$0xff]   ;;  %v1145_v8 = vld [vmem:[#allocation2 + $0x10] sm:$0xff]  }
  0xa7   :  { %1019 = vmatpush3.bf16.msra.mxu0 %v1135_v1  ;;  %1039 = vmatpush3.bf16.msra.mxu1 %v1143_v4  ;;  %v1140_v9 = vld [vmem:[%s1759_s2 + $0x28] sm:$0xff]   ;;  %v1146_v10 = vld [vmem:[#allocation2 + $0x18] sm:$0xff]   ;;  %v1141_v11 = vld [vmem:[%s1759_s2 + $0x30] sm:$0xff]  }
  0xa8   :  { %1020 = vmatprep.subr.bf16.mxu0 %v1446_v0  ;;  %1040 = vmatprep.subr.bf16.mxu1 %v1446_v0  ;;  %v1147_v12 = vld [vmem:[#allocation2 + $0x20] sm:$0xff]   ;;  %v1142_v13 = vld [vmem:[%s1759_s2 + $0x38] sm:$0xff]   ;;  %v1148_v14 = vld [vmem:[#allocation2 + $0x28] sm:$0xff]  }
  0xa9   :  { %v165_v15 = vld [vmem:[%s1757_s0] sm:$0xf]  ;;  %v1149_v16 = vld [vmem:[#allocation2 + $0x30] sm:$0xff]   ;;  %v1150_v17 = vld [vmem:[#allocation2 + $0x38] sm:$0xff]  }
  0xaa   :  { %v1151_v18 = vld [vmem:[#allocation7] ss:$8 sps:$4 sm:$0xff]   ;;  %v1153_v19 = vld [vmem:[#allocation7 + $0x4] ss:$8 sps:$4 sm:$0xff]   ;;  %v1156_v20 = vld [vmem:[#allocation7 + $0x14] ss:$8 sps:$4 sm:$0xff]  }
  0xab   :  { %1021 = vmatpush3.bf16.msra.mxu0 %v1136_v2  ;;  %1041 = vmatpush3.bf16.msra.mxu1 %v1144_v6  ;;  %v1154_v21 = vld [vmem:[#allocation7 + $0x10] ss:$8 sps:$4 sm:$0xff]   ;;  %v1159_v22 = vld [vmem:[#allocation7 + $0x24] ss:$8 sps:$4 sm:$0xff]   ;;  %v1157_v23 = vld [vmem:[#allocation7 + $0x20] ss:$8 sps:$4 sm:$0xff]   ;;  %v410_v2 = vlaneseq }
  0xac   :  { %1022 = vmatprep.subr.bf16.mxu0 %v1446_v0  ;;  %1042 = vmatprep.subr.bf16.mxu1 %v1446_v0  ;;  %v1162_v24 = vld [vmem:[#allocation7 + $0x34] ss:$8 sps:$4 sm:$0xff]   ;;  %v1160_v25 = vld [vmem:[#allocation7 + $0x30] ss:$8 sps:$4 sm:$0xff]   ;;  %v1165_v26 = vld [vmem:[#allocation7 + $0x44] ss:$8 sps:$4 sm:$0xff]  }
  0xad   :  { %v1163_v27 = vld [vmem:[#allocation7 + $0x40] ss:$8 sps:$4 sm:$0xff]   ;;  %v1168_v28 = vld [vmem:[#allocation7 + $0x54] ss:$8 sps:$4 sm:$0xff]   ;;  %v1166_v29 = vld [vmem:[#allocation7 + $0x50] ss:$8 sps:$4 sm:$0xff]  }
  0xae   :  { %v1171_v30 = vld [vmem:[#allocation7 + $0x64] ss:$8 sps:$4 sm:$0xff]   ;;  %v1169_v31 = vld [vmem:[#allocation7 + $0x60] ss:$8 sps:$4 sm:$0xff]   ;;  %v912_v32 = vld [vmem:[%s1760_s3] ss:$0 sm:$0xff] }
  0xaf   :  { %1023 = vmatpush3.bf16.msra.mxu0 %v1137_v3  ;;  %1043 = vmatpush3.bf16.msra.mxu1 %v1145_v8  ;;  %v1174_v40 = vld [vmem:[#allocation7 + $0x74] ss:$8 sps:$4 sm:$0xff]   ;;  %v1172_v41 = vld [vmem:[#allocation7 + $0x70] ss:$8 sps:$4 sm:$0xff]   ;;  %v1175_v43 = vld [vmem:[#allocation8] sm:$0xff]   ;;  %v411_v3 = vshrl.u32 %v410_v2, 7 }
  0xb0   :  { %1024 = vmatprep.subr.bf16.mxu0 %v1446_v0  ;;  %1044 = vmatprep.subr.bf16.mxu1 %v1446_v0  ;;  %v1176_v44 = vld [vmem:[#allocation8 + $0x8] sm:$0xff]   ;;  %v921_v45 = vld [vmem:[#allocation5] ss:$0 sm:$0xff]  ;;  %v1177_v53 = vld [vmem:[#allocation8 + $0x10] sm:$0xff]  }
  0xb1   :  { %v1178_v54 = vld [vmem:[#allocation8 + $0x18] sm:$0xff]   ;;  %v1179_v55 = vld [vmem:[#allocation8 + $0x20] sm:$0xff]   ;;  %v1180_v56 = vld [vmem:[#allocation8 + $0x28] sm:$0xff]   ;;  %v412_v4 = vsub.s32 0, %v411_v3  ;;  %v416_v6 = vsub.s32 1, %v411_v3 }
  0xb2   :  { %v1181_v57 = vld [vmem:[#allocation8 + $0x30] sm:$0xff]   ;;  %v1182_v58 = vld [vmem:[#allocation8 + $0x38] sm:$0xff]   ;;  %v1183_v59 = vld [vmem:[#allocation11] sm:$0xff]  }
  0xb3   :  { %1025 = vmatpush3.bf16.msra.mxu0 %v1138_v5  ;;  %1045 = vmatpush3.bf16.msra.mxu1 %v1146_v10  ;;  %v1184_v60 = vld [vmem:[#allocation11 + $0x8] sm:$0xff]   ;;  %v1185_v61 = vld [vmem:[#allocation11 + $0x10] sm:$0xff]   ;;  %v1186_v62 = vld [vmem:[#allocation11 + $0x18] sm:$0xff]  }
  0xb4   :  { %1026 = vmatprep.subr.bf16.mxu0 %v1446_v0  ;;  %1046 = vmatprep.subr.bf16.mxu1 %v1446_v0  ;;  %v1187_v63 = vld [vmem:[#allocation11 + $0x20] sm:$0xff]   ;;  %v1188_v1 = vld [vmem:[#allocation11 + $0x28] sm:$0xff]   ;;  %v408_v5 = vld [vmem:[%s1764_s7] sm:$0x3] }
  0xb5   :  { %v417_v8 = vrot.slane %v408_v5, %v416_v6 }
  0xb7   :  { %1027 = vmatpush3.bf16.msra.mxu0 %v1139_v7  ;;  %1047 = vmatpush3.bf16.msra.mxu1 %v1147_v12  ;;  %v413_v7 = vrot.slane %v408_v5, %v412_v4 }
  0xb8   :  { %1028 = vmatprep.subr.bf16.mxu0 %v1446_v0  ;;  %1048 = vmatprep.subr.bf16.mxu1 %v1446_v0 }
  0xbb   :  { %1029 = vmatpush3.bf16.msra.mxu0 %v1140_v9  ;;  %1049 = vmatpush3.bf16.msra.mxu1 %v1148_v14 }
  0xbc   :  { %1030 = vmatprep.subr.bf16.mxu0 %v1446_v0  ;;  %1050 = vmatprep.subr.bf16.mxu1 %v1446_v0 }
  0xbf   :  { %1031 = vmatpush3.bf16.msra.mxu0 %v1141_v11  ;;  %1051 = vmatpush3.bf16.msra.mxu1 %v1149_v16 }
  0xc0   :  { %1032 = vmatprep.subr.bf16.mxu0 %v1446_v0  ;;  %1052 = vmatprep.subr.bf16.mxu1 %v1446_v0 }
  0xc3   :  { %1033 = vmatpush3.bf16.msra.mxu0 %v1142_v13  ;;  %1053 = vmatpush3.bf16.msra.mxu1 %v1150_v17  ;;  %v544_v17 = vld [vmem:[%s1758_s1] sm:$0xff]  ;;  %s1449_s1 = smov [#allocation17]  }
  0xc4   :  { %1058 = vmatprep.subr.bf16.mxu1 %v1446_v0  ;;  %500 = vmatprep.subr.bf16.mxu0 %v1153_v19 }
  0xc6   :  { %1035 = vmatmul.mubr.bf16.vlgmr.msra.gmra.mrb[0].mxu0 %v165_v15 }
  0xc7   :  { %501 = vmatpush1.bf16.msra.mxu0 %v1151_v18  ;;  %532 = vmatprep.mubr.bf16.mxu0 %v1448_v42 }
  0xc8   :  { %502 = vmatprep.subr.bf16.mxu0 %v1156_v20 }
  0xcb   :  { %503 = vmatpush1.bf16.msra.mxu0 %v1154_v21 }
  0xcc   :  { %504 = vmatprep.subr.bf16.mxu0 %v1159_v22  ;;  %v1189_v22 = vld [vmem:[#allocation11 + $0x30] sm:$0xff]  }
  0xcf   :  { %505 = vmatpush1.bf16.msra.mxu0 %v1157_v23  ;;  %v1190_v23 = vld [vmem:[#allocation11 + $0x38] sm:$0xff]  }
  0xd0   :  { %506 = vmatprep.subr.bf16.mxu0 %v1162_v24  ;;  %v1191_v24 = vld [vmem:[#allocation14] sm:$0xff]  }
  0xd3   :  { %507 = vmatpush1.bf16.msra.mxu0 %v1160_v25  ;;  %v1192_v25 = vld [vmem:[#allocation14 + $0x8] sm:$0xff]  }
  0xd4   :  { %508 = vmatprep.subr.bf16.mxu0 %v1165_v26  ;;  %v1193_v26 = vld [vmem:[#allocation14 + $0x10] sm:$0xff]  }
  0xd7   :  { %509 = vmatpush1.bf16.msra.mxu0 %v1163_v27  ;;  %v1194_v27 = vld [vmem:[#allocation14 + $0x18] sm:$0xff]  }
  0xd8   :  { %510 = vmatprep.subr.bf16.mxu0 %v1168_v28  ;;  %v1195_v28 = vld [vmem:[#allocation14 + $0x20] sm:$0xff]  }
  0xdb   :  { %511 = vmatpush1.bf16.msra.mxu0 %v1166_v29  ;;  %v1196_v29 = vld [vmem:[#allocation14 + $0x28] sm:$0xff]  }
  0xdc   :  { %512 = vmatprep.subr.bf16.mxu0 %v1171_v30  ;;  %v946_v30 = vld [vmem:[#allocation10] ss:$0 sm:$0xff] }
  0xdf   :  { %513 = vmatpush1.bf16.msra.mxu0 %v1169_v31 }
  0xe0   :  { %514 = vmatprep.subr.bf16.mxu0 %v1174_v40  ;;  %v955_v40 = vld [vmem:[#allocation13] ss:$0 sm:$0xff] }
  0xe3   :  { %515 = vmatpush1.bf16.msra.mxu0 %v1172_v41 }
  0xe4   :  { %1078 = vmatprep.subr.bf16.mxu0 %v1446_v0 }
 0x199   :  { %v271_v33 = vpop.f32.mrb[0].mxu0 }
 0x19a   :  { %v272_v34 = vadd.f32 %v912_v32, %v271_v33  ;;  %v1036_v35 = vpop.f32.mrb[1].mxu0 }
 0x19b   :  { %v274_v36 = vpop.f32.mrb[2].mxu0 }
 0x19c   :  { %v277_v37 = vmax.f32 %v272_v34, 0.0  ;;  %v1037_v38 = vpop.f32.mrb[3].mxu0 }
 0x19d   :  { %v1197_v38 = vld [vmem:[#allocation14 + $0x30] sm:$0xff]  }
 0x19e   :  { %v278_v39 = vpack.c.bf16 %v277_v37, %v277_v37 }
 0x1a0   :  { %1055 = vmatmul.mubr.bf16.vlgmr.msra.gmra.mrb[0].mxu1 %v278_v39  ;;  %v1198_v39 = vld [vmem:[#allocation14 + $0x38] sm:$0xff]  }
 0x1a1   :  { %1074 = vmatprep.mubr.msk.bf16.mxu1 %vm1447_vm0, %v1446_v0  ;;  %1059 = vmatpush3.bf16.msra.mxu1 %v1175_v43 }
 0x1a2   :  { %1060 = vmatprep.subr.bf16.mxu1 %v1446_v0 }
 0x1a5   :  { %1061 = vmatpush3.bf16.msra.mxu1 %v1176_v44 }
 0x1a6   :  { %1062 = vmatprep.subr.bf16.mxu1 %v1446_v0 }
 0x1a9   :  { %1063 = vmatpush3.bf16.msra.mxu1 %v1177_v53 }
 0x1aa   :  { %1064 = vmatprep.subr.bf16.mxu1 %v1446_v0 }
 0x1ad   :  { %1065 = vmatpush3.bf16.msra.mxu1 %v1178_v54 }
 0x1ae   :  { %1066 = vmatprep.subr.bf16.mxu1 %v1446_v0 }
 0x1b1   :  { %1067 = vmatpush3.bf16.msra.mxu1 %v1179_v55 }
 0x1b2   :  { %1068 = vmatprep.subr.bf16.mxu1 %v1446_v0 }
 0x1b5   :  { %1069 = vmatpush3.bf16.msra.mxu1 %v1180_v56 }
 0x1b6   :  { %1070 = vmatprep.subr.bf16.mxu1 %v1446_v0 }
 0x1b9   :  { %1071 = vmatpush3.bf16.msra.mxu1 %v1181_v57 }
 0x1ba   :  { %1072 = vmatprep.subr.bf16.mxu1 %v1446_v0 }
 0x1bd   :  { %1073 = vmatpush3.bf16.msra.mxu1 %v1182_v58 }
 0x1be   :  { %1098 = vmatprep.subr.bf16.mxu1 %v1446_v0 }
 0x273   :  { %v384_v46 = vpop.f32.mrb[0].mxu1 }
 0x274   :  { %v385_v47 = vadd.f32 %v921_v45, %v384_v46  ;;  %v1056_v48 = vpop.f32.mrb[1].mxu1 }
 0x275   :  { %v387_v49 = vpop.f32.mrb[2].mxu1  ;;  %v964_v48 = vld [vmem:[#allocation16] ss:$0 sm:$0xff] }
 0x276   :  { %v390_v50 = vmax.f32 %v385_v47, 0.0  ;;  %v1057_v51 = vpop.f32.mrb[3].mxu1 }
 0x278   :  { %v391_v52 = vpack.c.bf16 %v390_v50, %v390_v50 }
 0x27a   :  { %533 = vmatmul.mubr.bf16.vlgmr.msra.gmra.mrb[4].mxu0 %v391_v52 }
 0x27b   :  { %1094 = vmatprep.mubr.msk.bf16.mxu0 %vm1447_vm0, %v1446_v0  ;;  %1079 = vmatpush3.bf16.msra.mxu0 %v1183_v59 }
 0x27c   :  { %1080 = vmatprep.subr.bf16.mxu0 %v1446_v0 }
 0x27f   :  { %1081 = vmatpush3.bf16.msra.mxu0 %v1184_v60 }
 0x280   :  { %1082 = vmatprep.subr.bf16.mxu0 %v1446_v0 }
 0x283   :  { %1083 = vmatpush3.bf16.msra.mxu0 %v1185_v61 }
 0x284   :  { %1084 = vmatprep.subr.bf16.mxu0 %v1446_v0 }
 0x287   :  { %1085 = vmatpush3.bf16.msra.mxu0 %v1186_v62 }
 0x288   :  { %1086 = vmatprep.subr.bf16.mxu0 %v1446_v0 }
 0x28b   :  { %1087 = vmatpush3.bf16.msra.mxu0 %v1187_v63 }
 0x28c   :  { %1088 = vmatprep.subr.bf16.mxu0 %v1446_v0 }
 0x28f   :  { %1089 = vmatpush3.bf16.msra.mxu0 %v1188_v1 }
 0x290   :  { %1090 = vmatprep.subr.bf16.mxu0 %v1446_v0 }
 0x293   :  { %1091 = vmatpush3.bf16.msra.mxu0 %v1189_v22 }
 0x294   :  { %1092 = vmatprep.subr.bf16.mxu0 %v1446_v0 }
 0x297   :  { %1093 = vmatpush3.bf16.msra.mxu0 %v1190_v23 }
 0x34d   :  { %v534_v9 = vpop.f32.mrb[4].mxu0 }
 0x34e   :  { %v535_v10 = vadd.f32 %v534_v9, %v413_v7  ;;  %v536_v11 = vpop.f32.mrb[5].mxu0 }
 0x34f   :  { %v537_v12 = vadd.f32 %v536_v11, %v417_v8  ;;  %v538_v13 = vpop.f32.mrb[6].mxu0 }
 0x350   :  { %886 = vst [vmem:[%s1772_s15] sm:$0xff] %v535_v10  ;;  %v539_v14 = vpop.f32.mrb[7].mxu0 }
 0x351   :  { %v541_v15 = vmul.f32 0.5, %v537_v12  ;;  %887 = vst [vmem:[%s1772_s15 + $0x8] sm:$0xff] %v537_v12 }
 0x353   :  { %v542_v16 = vmul.f32 1.442695, %v541_v15 }
 0x355   :  { %1199 = vpow2.f32 %v542_v16 }
 0x35f   :  { %v1200_v18 = vpop.eup %1199 }
 0x360   :  { %v545_v19 = vmul.f32 %v1200_v18, %v544_v17 }
 0x362   :  { %v546_v20 = vadd.f32 %v545_v19, %v535_v10 }
 0x364   :  { %v547_v21 = vpack.c.bf16 %v546_v20, %v546_v20  ;;  %888 = vst [vmem:[%s1772_s15 + $0x10] sm:$0xff] %v546_v20  ;;  %s895_s15 = sshll.u32 %s1449_s1, 4  ;;  %s896_s15 = int_to_ptr.vmem [resolvable:$true] %s895_s15 }
 0x365   :  { %s1399_s4 = scalar_lea.vmem %s896_s15, 128  ;;  %p1404_p3 = scmp.lt.s32.totalorder %s896_s15, %s896_s15 }
 0x366   :  { %1075 = vmatmul.mubr.bf16.vlgmr.msra.gmra.mrb[4].mxu1 %v547_v21  ;;  %p1400_p2 = scmp.ne.s32.totalorder %s896_s15, %s1399_s4  ;;  %p1405_p4 = scmp.lt.s32.totalorder %s1399_s4, %s1399_s4 }
 0x367   :  { %1114 = vmatprep.mubr.msk.bf16.mxu1 %vm1447_vm0, %v1446_v0  ;;  %1099 = vmatpush3.bf16.msra.mxu1 %v1191_v24 }
 0x368   :  { %1100 = vmatprep.subr.bf16.mxu1 %v1446_v0  ;;  %p1406_p5 = por %p1405_p4, %p1404_p3 }
 0x36a   :  { %p1407_p6 = pnand %p1406_p5, %p1400_p2 }
 0x36b   :  { %1101 = vmatpush3.bf16.msra.mxu1 %v1192_v25 }
 0x36c   :  { %1102 = vmatprep.subr.bf16.mxu1 %v1446_v0 }
 0x36f   :  { %1103 = vmatpush3.bf16.msra.mxu1 %v1193_v26 }
 0x370   :  { %1104 = vmatprep.subr.bf16.mxu1 %v1446_v0 }
 0x373   :  { %1105 = vmatpush3.bf16.msra.mxu1 %v1194_v27 }
 0x374   :  { %1106 = vmatprep.subr.bf16.mxu1 %v1446_v0 }
 0x377   :  { %1107 = vmatpush3.bf16.msra.mxu1 %v1195_v28 }
 0x378   :  { %1108 = vmatprep.subr.bf16.mxu1 %v1446_v0 }
 0x37b   :  { %1109 = vmatpush3.bf16.msra.mxu1 %v1196_v29 }
 0x37c   :  { %1110 = vmatprep.subr.bf16.mxu1 %v1446_v0 }
 0x37f   :  { %1111 = vmatpush3.bf16.msra.mxu1 %v1197_v38 }
 0x380   :  { %1112 = vmatprep.subr.bf16.mxu1 %v1446_v0 }
 0x383   :  { %1113 = vmatpush3.bf16.msra.mxu1 %v1198_v39 }
 0x439   :  { %v653_v31 = vpop.f32.mrb[4].mxu1 }
 0x43a   :  { %v654_v32 = vadd.f32 %v946_v30, %v653_v31  ;;  %v1076_v33 = vpop.f32.mrb[5].mxu1 }
 0x43b   :  { %v656_v34 = vpop.f32.mrb[6].mxu1 }
 0x43c   :  { %v659_v35 = vmax.f32 %v654_v32, 0.0  ;;  %v1077_v36 = vpop.f32.mrb[7].mxu1 }
 0x43e   :  { %v660_v37 = vpack.c.bf16 %v659_v35, %v659_v35 }
 0x440   :  { %1095 = vmatmul.mubr.bf16.vlgmr.msra.gmra.mrb[8].mxu0 %v660_v37 }
 0x513   :  { %v766_v41 = vpop.f32.mrb[8].mxu0 }
 0x514   :  { %v767_v42 = vadd.f32 %v955_v40, %v766_v41  ;;  %v1096_v43 = vpop.f32.mrb[9].mxu0 }
 0x515   :  { %v769_v44 = vpop.f32.mrb[10].mxu0 }
 0x516   :  { %v772_v45 = vmax.f32 %v767_v42, 0.0  ;;  %v1097_v46 = vpop.f32.mrb[11].mxu0 }
 0x518   :  { %v773_v47 = vpack.c.bf16 %v772_v45, %v772_v45 }
 0x51a   :  { %1115 = vmatmul.mubr.bf16.vlgmr.msra.gmra.mrb[8].mxu1 %v773_v47 }
 0x5ed   :  { %v879_v49 = vpop.f32.mrb[8].mxu1 }
 0x5ee   :  { %v880_v50 = vadd.f32 %v964_v48, %v879_v49  ;;  %v1116_v51 = vpop.f32.mrb[9].mxu1 }
 0x5ef   :  { %v882_v52 = vpop.f32.mrb[10].mxu1 }
 0x5f0   :  { %885 = vst [vmem:[#allocation17] sm:$0xff] %v880_v50  ;;  %v1117_v0 = vpop.f32.mrb[11].mxu1 }
 0x5f1   :  { %1410 = shalt.err (!%p1407_p6)
}
 0x5f2   :  { %s1411_s30 = scalar_lea.hbm %s1771_s14, 128 }
 0x5f3   :  { %p1412_p7 = scmp.ne.s32.totalorder %s1771_s14, %s1411_s30  ;;  %p1415_p8 = scmp.lt.u32.totalorder %s1411_s30, %s1771_s14 }
 0x5f5   :  { %p1417_p9 = pnand %p1415_p8, %p1412_p7 }
 0x5f7   :  { %1420 = shalt.err (!%p1417_p9)
}
 0x5f8   :  { %898 = dma.vmem_to_hbm [thread:$0]  %s896_s15, 128, %s1771_s14, [#allocation4]  }
 0x5f9   :  { %1431 = dma.done.wait [#allocation4], 128  }
 0x5fa   :  { %1432 = vsyncadd [#allocation4], 4294967168 }
 0x5fb   :  { %906 = vsyncpa [#allocation3], 1 }
 0x5fc   :  { %907 = vsyncpa [#allocation6], 1 }
 0x5fd   :  { %908 = vsyncpa [#allocation9], 1 }
 0x5fe   :  { %909 = vsyncpa [#allocation12], 1 }
 0x5ff   :  { %910 = vsyncpa [#allocation15], 1 }
 0x600   :  { %911 = vsyncpa [#allocation4], 1 }

</bundles_post_ra>
